<compile_context>
chip_gen: v7x
topology: tpu7x:2x2x1
jax: 0.10.0
libtpu: 0.0.40
codegen_flags: <defaults>
</compile_context>

<pallas_src>
import numpy as np
import jax
import jax.numpy as jnp
from jax.experimental import pallas as pl
from jax.experimental.pallas import tpu as pltpu

EPS = 1e-5


# ---------------------------------------------------------------------------
# Host-side (numpy) constant builders — depend only on static shapes.
# ---------------------------------------------------------------------------
def _bilinear_matrix_np(n_out: int, n_in: int) -> np.ndarray:
    """1-D bilinear resize matrix, align_corners=True (row-stochastic)."""
    A = np.zeros((n_out, n_in), np.float32)
    if n_out == 1 or n_in == 1:
        A[:, 0] = 1.0
        return A
    for i in range(n_out):
        src = i * (n_in - 1) / (n_out - 1)
        i0 = min(int(np.floor(src)), n_in - 1)
        i1 = min(i0 + 1, n_in - 1)
        f = src - i0
        A[i, i0] += 1.0 - f
        A[i, i1] += f
    return A


def _upsample_pad_matrix_np(H1, W1, H, W) -> np.ndarray:
    """(H1*W1, H*W) matrix M such that x1_flat @ M == flat(pad(bilinear_x2(x1)))."""
    Ho, Wo = 2 * H1, 2 * W1
    Ah = _bilinear_matrix_np(Ho, H1)
    Aw = _bilinear_matrix_np(Wo, W1)
    K = np.kron(Ah, Aw)                                   # (Ho*Wo, H1*W1)
    py, px = (H - Ho) // 2, (W - Wo) // 2                 # F.pad offsets (diff//2)
    Kpad = np.zeros((H, W, H1 * W1), np.float32)
    Kpad[py:py + Ho, px:px + Wo, :] = K.reshape(Ho, Wo, H1 * W1)
    return np.ascontiguousarray(Kpad.reshape(H * W, H1 * W1).T)


def _tap_masks_np(H, W) -> np.ndarray:
    """(9, H*W) {0,1} validity masks for the 9 conv taps (dy,dx in {-1,0,1})."""
    m = np.zeros((9, H, W), np.float32)
    k = 0
    for dy in (-1, 0, 1):
        for dx in (-1, 0, 1):
            r0, r1 = max(0, -dy), min(H, H - dy)
            c0, c1 = max(0, -dx), min(W, W - dx)
            m[k, r0:r1, c0:c1] = 1.0
            k += 1
    return m.reshape(9, H * W)


# ---------------------------------------------------------------------------
# Fused Up.forward
# ---------------------------------------------------------------------------
def up_forward(x1: jnp.ndarray, x2: jnp.ndarray, p: dict) -> jnp.ndarray:
    B, C1, H1, W1 = x1.shape
    B2, C2, H, W = x2.shape
    assert B == B2
    Cin = C2 + C1
    Cmid = p["w1"].shape[0]
    Cout = p["w2"].shape[0]
    HW = H * W

    # static constants
    kpt = jnp.asarray(_upsample_pad_matrix_np(H1, W1, H, W))     # (H1*W1, HW)
    masks = jnp.asarray(_tap_masks_np(H, W))                     # (9, HW)
    taps = [(dy, dx) for dy in (-1, 0, 1) for dx in (-1, 0, 1)]  # k = (dy+1)*3+(dx+1)

    # Fold BatchNorm (inference) into the conv weights + a per-channel bias:
    #   relu(BN(conv(x))) = relu((s .* W) * patch + (b - m*s))
    s1 = p["g1"] / jnp.sqrt(p["v1"] + EPS)                       # (Cmid,)
    b1 = (p["b1"] - p["m1"] * s1).reshape(Cmid, 1)
    s2 = p["g2"] / jnp.sqrt(p["v2"] + EPS)                       # (Cout,)
    b2 = (p["b2"] - p["m2"] * s2).reshape(Cout, 1)

    # OIHW -> (O, 9*I) with BN scale folded into the rows.
    # Column index = (kh*3+kw)*Cin + ci, matching the im2col patch row order below.
    w1mat = (jnp.transpose(p["w1"], (0, 2, 3, 1)).reshape(Cmid, 9 * Cin)
             * s1.reshape(Cmid, 1))
    w2mat = (jnp.transpose(p["w2"], (0, 2, 3, 1)).reshape(Cout, 9 * Cmid)
             * s2.reshape(Cout, 1))

    # free metadata reshapes (NCHW is contiguous): spatial onto the lane axis
    x1f = x1.reshape(B, C1, H1 * W1)
    x2f = x2.reshape(B, C2, HW)

    def kernel(x1_ref, x2_ref, kpt_ref, w1_ref, b1_ref,
               w2_ref, b2_ref, m_ref, o_ref):
        # bilinear upsample x2 + center zero-pad, as a single MXU matmul
        up = jnp.dot(x1_ref[0], kpt_ref[...],
                     preferred_element_type=jnp.float32)          # (C1, HW)
        # channel concat([x2, x1_up]) on the sublane axis (matches torch.cat order)
        xcat = jnp.concatenate([x2_ref[0], up], axis=0)           # (Cin, HW)
        mall = m_ref[...]                                         # (9, HW), loaded once

        def conv_bn_relu(x, wmat, b):
            # im2col in the flattened layout: masked lane rotations (XLU), then
            # ONE matmul with K = 9*C instead of 9 tiny K=C matmuls.
            pieces = []
            for k, (dy, dx) in enumerate(taps):
                sft = (-(dy * W + dx)) % HW
                v = pltpu.roll(x, sft, 1) if sft else x
                if dy == 0 and dx == 0:
                    pieces.append(v)                              # center mask == 1
                else:
                    pieces.append(v * mall[k:k + 1, :])
            patch = jnp.concatenate(pieces, axis=0)               # (9*C, HW)
            y = jnp.dot(wmat, patch, preferred_element_type=jnp.float32)
            return jnp.maximum(y + b, 0.0)                        # bias + ReLU (f32)

        h = conv_bn_relu(xcat, w1_ref[...], b1_ref[...])          # (Cmid, HW)
        out = conv_bn_relu(h, w2_ref[...], b2_ref[...])           # (Cout, HW)
        o_ref[0] = out.astype(o_ref.dtype)                        # lane-dense store

    out = pl.pallas_call(
        kernel,
        out_shape=jax.ShapeDtypeStruct((B, Cout, HW), jnp.float32),
        grid=(B,),
        in_specs=[
            pl.BlockSpec((1, C1, H1 * W1), lambda b: (b, 0, 0)),
            pl.BlockSpec((1, C2, HW), lambda b: (b, 0, 0)),
            pl.BlockSpec((H1 * W1, HW), lambda b: (0, 0)),
            pl.BlockSpec((Cmid, 9 * Cin), lambda b: (0, 0)),
            pl.BlockSpec((Cmid, 1), lambda b: (0, 0)),
            pl.BlockSpec((Cout, 9 * Cmid), lambda b: (0, 0)),
            pl.BlockSpec((Cout, 1), lambda b: (0, 0)),
            pl.BlockSpec((9, HW), lambda b: (0, 0)),
        ],
        out_specs=pl.BlockSpec((1, Cout, HW), lambda b: (b, 0, 0)),
        compiler_params=pltpu.CompilerParams(
            dimension_semantics=("parallel",)),
    )(x1f, x2f, kpt, w1mat, b1, w2mat, b2, masks)

    return out.reshape(B, Cout, H, W)                             # free reshape (NCHW)


# ---------------------------------------------------------------------------
# Pure-JAX reference (correctness check)
# ---------------------------------------------------------------------------
def up_reference(x1, x2, p):
    B, C, H1, W1 = x1.shape
    ah = jnp.asarray(_bilinear_matrix_np(2 * H1, H1))
    aw = jnp.asarray(_bilinear_matrix_np(2 * W1, W1))
    up = jnp.einsum("oh,bchw->bcow", ah, x1)
    up = jnp.einsum("pw,bcow->bcop", aw, up)
    dy = x2.shape[2] - up.shape[2]
    dx = x2.shape[3] - up.shape[3]
    up = jnp.pad(up, ((0, 0), (0, 0),
                      (dy // 2, dy - dy // 2), (dx // 2, dx - dx // 2)))
    x = jnp.concatenate([x2, up], axis=1)

    def cbr(x, w, g, b, m, v):
        y = jax.lax.conv_general_dilated(
            x, w, (1, 1), "SAME",
            dimension_numbers=("NCHW", "OIHW", "NCHW"))
        s = g / jnp.sqrt(v + EPS)
        y = y * s[None, :, None, None] + (b - m * s)[None, :, None, None]
        return jnp.maximum(y, 0.0)

    x = cbr(x, p["w1"], p["g1"], p["b1"], p["m1"], p["v1"])
    x = cbr(x, p["w2"], p["g2"], p["b2"], p["m2"], p["v2"])
    return x


if __name__ == "__main__":
    key = jax.random.PRNGKey(0)
    ks = jax.random.split(key, 12)

    B = 2
    in_channels, out_channels = 8, 4
    mid_channels = in_channels // 2            # bilinear=True path

    # skip connection x2 has full resolution; x1 comes from one level deeper
    x1 = jax.random.normal(ks[0], (B, in_channels // 2, 8, 8), jnp.float32)
    x2 = jax.random.normal(ks[1], (B, in_channels // 2, 16, 16), jnp.float32)

    params = {
        "w1": 0.1 * jax.random.normal(ks[2], (mid_channels, in_channels, 3, 3), jnp.float32),
        "g1": jax.random.uniform(ks[3], (mid_channels,), jnp.float32, 0.5, 1.5),
        "b1": 0.1 * jax.random.normal(ks[4], (mid_channels,), jnp.float32),
        "m1": 0.1 * jax.random.normal(ks[5], (mid_channels,), jnp.float32),
        "v1": jax.random.uniform(ks[6], (mid_channels,), jnp.float32, 0.5, 1.5),
        "w2": 0.1 * jax.random.normal(ks[7], (out_channels, mid_channels, 3, 3), jnp.float32),
        "g2": jax.random.uniform(ks[8], (out_channels,), jnp.float32, 0.5, 1.5),
        "b2": 0.1 * jax.random.normal(ks[9], (out_channels,), jnp.float32),
        "m2": 0.1 * jax.random.normal(ks[10], (out_channels,), jnp.float32),
        "v2": jax.random.uniform(ks[11], (out_channels,), jnp.float32, 0.5, 1.5),
    }

    out = jax.block_until_ready(up_forward(x1, x2, params))
    ref = jax.block_until_ready(up_reference(x1, x2, params))

    assert out.shape == (B, out_channels, 16, 16), out.shape
    max_err = float(jnp.max(jnp.abs(out - ref)))
    if max_err > 2e-3:
        raise AssertionError(f"mismatch vs reference, max abs err = {max_err}")

    print("KERNEL_OK")
</pallas_src>

<mosaic_0001>
module attributes {stable_mosaic.version = 11 : i64} {
  func.func @kernel(%arg0: i32, %arg1: memref<1x4x64xf32, #tpu.memory_space<vmem>>, %arg2: memref<1x4x256xf32, #tpu.memory_space<vmem>>, %arg3: memref<64x256xf32, #tpu.memory_space<vmem>>, %arg4: memref<4x72xf32, #tpu.memory_space<vmem>>, %arg5: memref<4x1xf32, #tpu.memory_space<vmem>>, %arg6: memref<4x36xf32, #tpu.memory_space<vmem>>, %arg7: memref<4x1xf32, #tpu.memory_space<vmem>>, %arg8: memref<9x256xf32, #tpu.memory_space<vmem>>, %arg9: memref<1x4x256xf32, #tpu.memory_space<vmem>>) attributes {dimension_semantics = [#tpu.dimension_semantics<parallel>], iteration_bounds = array<i64: 2>, scalar_prefetch = 0 : i64, scratch_operands = 0 : i64, tpu.core_type = #tpu.core_type<tc>, window_params = [{transform_indices = @transform_0, window_bounds = array<i64: 1, 4, 64>}, {transform_indices = @transform_1, window_bounds = array<i64: 1, 4, 256>}, {pipeline_mode = #tpu.pipeline_mode<synchronous>, transform_indices = @transform_2, window_bounds = array<i64: 64, 256>}, {pipeline_mode = #tpu.pipeline_mode<synchronous>, transform_indices = @transform_3, window_bounds = array<i64: 4, 72>}, {pipeline_mode = #tpu.pipeline_mode<synchronous>, transform_indices = @transform_4, window_bounds = array<i64: 4, 1>}, {pipeline_mode = #tpu.pipeline_mode<synchronous>, transform_indices = @transform_5, window_bounds = array<i64: 4, 36>}, {pipeline_mode = #tpu.pipeline_mode<synchronous>, transform_indices = @transform_6, window_bounds = array<i64: 4, 1>}, {pipeline_mode = #tpu.pipeline_mode<synchronous>, transform_indices = @transform_7, window_bounds = array<i64: 9, 256>}, {transform_indices = @transform_8, window_bounds = array<i64: 1, 4, 256>}]} {
    %c0 = arith.constant 0 : index
    %c0_0 = arith.constant 0 : index
    %c0_1 = arith.constant 0 : index
    %0 = vector.load %arg1[%c0, %c0_0, %c0_1] : memref<1x4x64xf32, #tpu.memory_space<vmem>>, vector<1x4x64xf32>
    %1 = vector.shape_cast %0 : vector<1x4x64xf32> to vector<4x64xf32>
    %c0_2 = arith.constant 0 : index
    %c0_3 = arith.constant 0 : index
    %2 = vector.load %arg3[%c0_2, %c0_3] : memref<64x256xf32, #tpu.memory_space<vmem>>, vector<64x256xf32>
    %cst = arith.constant dense<0.000000e+00> : vector<4x256xf32>
    %3 = tpu.matmul %1, %2, %cst {dimension_numbers = #tpu.dot_dimension_numbers<[1], [0], [0], [1], [0, 0, 1, 1], [], []>} : vector<4x64xf32>, vector<64x256xf32>, vector<4x256xf32> -> vector<4x256xf32>
    %c0_4 = arith.constant 0 : index
    %c0_5 = arith.constant 0 : index
    %c0_6 = arith.constant 0 : index
    %4 = vector.load %arg2[%c0_4, %c0_5, %c0_6] : memref<1x4x256xf32, #tpu.memory_space<vmem>>, vector<1x4x256xf32>
    %5 = vector.shape_cast %4 : vector<1x4x256xf32> to vector<4x256xf32>
    %6 = tpu.concatenate %5, %3 in 0 : vector<4x256xf32>, vector<4x256xf32> -> vector<8x256xf32>
    %c0_7 = arith.constant 0 : index
    %c0_8 = arith.constant 0 : index
    %7 = vector.load %arg8[%c0_7, %c0_8] : memref<9x256xf32, #tpu.memory_space<vmem>>, vector<9x256xf32>
    %c0_9 = arith.constant 0 : index
    %c0_10 = arith.constant 0 : index
    %8 = vector.load %arg4[%c0_9, %c0_10] : memref<4x72xf32, #tpu.memory_space<vmem>>, vector<4x72xf32>
    %c0_11 = arith.constant 0 : index
    %c0_12 = arith.constant 0 : index
    %9 = vector.load %arg5[%c0_11, %c0_12] : memref<4x1xf32, #tpu.memory_space<vmem>>, vector<4x1xf32>
    %c17_i32 = arith.constant 17 : i32
    %10 = tpu.dynamic_rotate %6 by %c17_i32 dim 1 : vector<8x256xf32>, i32 -> vector<8x256xf32>
    %11 = vector.extract_strided_slice %7 {offsets = [0, 0], sizes = [1, 256], strides = [1, 1]} : vector<9x256xf32> to vector<1x256xf32>
    %12 = vector.broadcast %11 : vector<1x256xf32> to vector<8x256xf32>
    %13 = arith.mulf %10, %12 : vector<8x256xf32>
    %c16_i32 = arith.constant 16 : i32
    %14 = tpu.dynamic_rotate %6 by %c16_i32 dim 1 : vector<8x256xf32>, i32 -> vector<8x256xf32>
    %15 = vector.extract_strided_slice %7 {offsets = [1, 0], sizes = [1, 256], strides = [1, 1]} : vector<9x256xf32> to vector<1x256xf32>
    %16 = vector.broadcast %15 : vector<1x256xf32> to vector<8x256xf32>
    %17 = arith.mulf %14, %16 : vector<8x256xf32>
    %c15_i32 = arith.constant 15 : i32
    %18 = tpu.dynamic_rotate %6 by %c15_i32 dim 1 : vector<8x256xf32>, i32 -> vector<8x256xf32>
    %19 = vector.extract_strided_slice %7 {offsets = [2, 0], sizes = [1, 256], strides = [1, 1]} : vector<9x256xf32> to vector<1x256xf32>
    %20 = vector.broadcast %19 : vector<1x256xf32> to vector<8x256xf32>
    %21 = arith.mulf %18, %20 : vector<8x256xf32>
    %c1_i32 = arith.constant 1 : i32
    %22 = tpu.dynamic_rotate %6 by %c1_i32 dim 1 : vector<8x256xf32>, i32 -> vector<8x256xf32>
    %23 = vector.extract_strided_slice %7 {offsets = [3, 0], sizes = [1, 256], strides = [1, 1]} : vector<9x256xf32> to vector<1x256xf32>
    %24 = vector.broadcast %23 : vector<1x256xf32> to vector<8x256xf32>
    %25 = arith.mulf %22, %24 : vector<8x256xf32>
    %c255_i32 = arith.constant 255 : i32
    %26 = tpu.dynamic_rotate %6 by %c255_i32 dim 1 : vector<8x256xf32>, i32 -> vector<8x256xf32>
    %27 = vector.extract_strided_slice %7 {offsets = [5, 0], sizes = [1, 256], strides = [1, 1]} : vector<9x256xf32> to vector<1x256xf32>
    %28 = vector.broadcast %27 : vector<1x256xf32> to vector<8x256xf32>
    %29 = arith.mulf %26, %28 : vector<8x256xf32>
    %c241_i32 = arith.constant 241 : i32
    %30 = tpu.dynamic_rotate %6 by %c241_i32 dim 1 : vector<8x256xf32>, i32 -> vector<8x256xf32>
    %31 = vector.extract_strided_slice %7 {offsets = [6, 0], sizes = [1, 256], strides = [1, 1]} : vector<9x256xf32> to vector<1x256xf32>
    %32 = vector.broadcast %31 : vector<1x256xf32> to vector<8x256xf32>
    %33 = arith.mulf %30, %32 : vector<8x256xf32>
    %c240_i32 = arith.constant 240 : i32
    %34 = tpu.dynamic_rotate %6 by %c240_i32 dim 1 : vector<8x256xf32>, i32 -> vector<8x256xf32>
    %35 = vector.extract_strided_slice %7 {offsets = [7, 0], sizes = [1, 256], strides = [1, 1]} : vector<9x256xf32> to vector<1x256xf32>
    %36 = vector.broadcast %35 : vector<1x256xf32> to vector<8x256xf32>
    %37 = arith.mulf %34, %36 : vector<8x256xf32>
    %c239_i32 = arith.constant 239 : i32
    %38 = tpu.dynamic_rotate %6 by %c239_i32 dim 1 : vector<8x256xf32>, i32 -> vector<8x256xf32>
    %39 = vector.extract_strided_slice %7 {offsets = [8, 0], sizes = [1, 256], strides = [1, 1]} : vector<9x256xf32> to vector<1x256xf32>
    %40 = vector.broadcast %39 : vector<1x256xf32> to vector<8x256xf32>
    %41 = arith.mulf %38, %40 : vector<8x256xf32>
    %42 = tpu.concatenate %13, %17, %21, %25, %6, %29, %33, %37, %41 in 0 : vector<8x256xf32>, vector<8x256xf32>, vector<8x256xf32>, vector<8x256xf32>, vector<8x256xf32>, vector<8x256xf32>, vector<8x256xf32>, vector<8x256xf32>, vector<8x256xf32> -> vector<72x256xf32>
    %cst_13 = arith.constant dense<0.000000e+00> : vector<4x256xf32>
    %43 = tpu.matmul %8, %42, %cst_13 {dimension_numbers = #tpu.dot_dimension_numbers<[1], [0], [0], [1], [0, 0, 1, 1], [], []>} : vector<4x72xf32>, vector<72x256xf32>, vector<4x256xf32> -> vector<4x256xf32>
    %44 = vector.broadcast %9 : vector<4x1xf32> to vector<4x256xf32>
    %45 = arith.addf %43, %44 : vector<4x256xf32>
    %cst_14 = arith.constant 0.000000e+00 : f32
    %46 = vector.broadcast %cst_14 : f32 to vector<4x256xf32>
    %47 = arith.maximumf %45, %46 : vector<4x256xf32>
    %c0_15 = arith.constant 0 : index
    %c0_16 = arith.constant 0 : index
    %48 = vector.load %arg6[%c0_15, %c0_16] : memref<4x36xf32, #tpu.memory_space<vmem>>, vector<4x36xf32>
    %c0_17 = arith.constant 0 : index
    %c0_18 = arith.constant 0 : index
    %49 = vector.load %arg7[%c0_17, %c0_18] : memref<4x1xf32, #tpu.memory_space<vmem>>, vector<4x1xf32>
    %c17_i32_19 = arith.constant 17 : i32
    %50 = tpu.dynamic_rotate %47 by %c17_i32_19 dim 1 : vector<4x256xf32>, i32 -> vector<4x256xf32>
    %51 = vector.extract_strided_slice %7 {offsets = [0, 0], sizes = [1, 256], strides = [1, 1]} : vector<9x256xf32> to vector<1x256xf32>
    %52 = vector.broadcast %51 : vector<1x256xf32> to vector<4x256xf32>
    %53 = arith.mulf %50, %52 : vector<4x256xf32>
    %c16_i32_20 = arith.constant 16 : i32
    %54 = tpu.dynamic_rotate %47 by %c16_i32_20 dim 1 : vector<4x256xf32>, i32 -> vector<4x256xf32>
    %55 = vector.extract_strided_slice %7 {offsets = [1, 0], sizes = [1, 256], strides = [1, 1]} : vector<9x256xf32> to vector<1x256xf32>
    %56 = vector.broadcast %55 : vector<1x256xf32> to vector<4x256xf32>
    %57 = arith.mulf %54, %56 : vector<4x256xf32>
    %c15_i32_21 = arith.constant 15 : i32
    %58 = tpu.dynamic_rotate %47 by %c15_i32_21 dim 1 : vector<4x256xf32>, i32 -> vector<4x256xf32>
    %59 = vector.extract_strided_slice %7 {offsets = [2, 0], sizes = [1, 256], strides = [1, 1]} : vector<9x256xf32> to vector<1x256xf32>
    %60 = vector.broadcast %59 : vector<1x256xf32> to vector<4x256xf32>
    %61 = arith.mulf %58, %60 : vector<4x256xf32>
    %c1_i32_22 = arith.constant 1 : i32
    %62 = tpu.dynamic_rotate %47 by %c1_i32_22 dim 1 : vector<4x256xf32>, i32 -> vector<4x256xf32>
    %63 = vector.extract_strided_slice %7 {offsets = [3, 0], sizes = [1, 256], strides = [1, 1]} : vector<9x256xf32> to vector<1x256xf32>
    %64 = vector.broadcast %63 : vector<1x256xf32> to vector<4x256xf32>
    %65 = arith.mulf %62, %64 : vector<4x256xf32>
    %c255_i32_23 = arith.constant 255 : i32
    %66 = tpu.dynamic_rotate %47 by %c255_i32_23 dim 1 : vector<4x256xf32>, i32 -> vector<4x256xf32>
    %67 = vector.extract_strided_slice %7 {offsets = [5, 0], sizes = [1, 256], strides = [1, 1]} : vector<9x256xf32> to vector<1x256xf32>
    %68 = vector.broadcast %67 : vector<1x256xf32> to vector<4x256xf32>
    %69 = arith.mulf %66, %68 : vector<4x256xf32>
    %c241_i32_24 = arith.constant 241 : i32
    %70 = tpu.dynamic_rotate %47 by %c241_i32_24 dim 1 : vector<4x256xf32>, i32 -> vector<4x256xf32>
    %71 = vector.extract_strided_slice %7 {offsets = [6, 0], sizes = [1, 256], strides = [1, 1]} : vector<9x256xf32> to vector<1x256xf32>
    %72 = vector.broadcast %71 : vector<1x256xf32> to vector<4x256xf32>
    %73 = arith.mulf %70, %72 : vector<4x256xf32>
    %c240_i32_25 = arith.constant 240 : i32
    %74 = tpu.dynamic_rotate %47 by %c240_i32_25 dim 1 : vector<4x256xf32>, i32 -> vector<4x256xf32>
    %75 = vector.extract_strided_slice %7 {offsets = [7, 0], sizes = [1, 256], strides = [1, 1]} : vector<9x256xf32> to vector<1x256xf32>
    %76 = vector.broadcast %75 : vector<1x256xf32> to vector<4x256xf32>
    %77 = arith.mulf %74, %76 : vector<4x256xf32>
    %c239_i32_26 = arith.constant 239 : i32
    %78 = tpu.dynamic_rotate %47 by %c239_i32_26 dim 1 : vector<4x256xf32>, i32 -> vector<4x256xf32>
    %79 = vector.extract_strided_slice %7 {offsets = [8, 0], sizes = [1, 256], strides = [1, 1]} : vector<9x256xf32> to vector<1x256xf32>
    %80 = vector.broadcast %79 : vector<1x256xf32> to vector<4x256xf32>
    %81 = arith.mulf %78, %80 : vector<4x256xf32>
    %82 = tpu.concatenate %53, %57, %61, %65, %47, %69, %73, %77, %81 in 0 : vector<4x256xf32>, vector<4x256xf32>, vector<4x256xf32>, vector<4x256xf32>, vector<4x256xf32>, vector<4x256xf32>, vector<4x256xf32>, vector<4x256xf32>, vector<4x256xf32> -> vector<36x256xf32>
    %cst_27 = arith.constant dense<0.000000e+00> : vector<4x256xf32>
    %83 = tpu.matmul %48, %82, %cst_27 {dimension_numbers = #tpu.dot_dimension_numbers<[1], [0], [0], [1], [0, 0, 1, 1], [], []>} : vector<4x36xf32>, vector<36x256xf32>, vector<4x256xf32> -> vector<4x256xf32>
    %84 = vector.broadcast %49 : vector<4x1xf32> to vector<4x256xf32>
    %85 = arith.addf %83, %84 : vector<4x256xf32>
    %cst_28 = arith.constant 0.000000e+00 : f32
    %86 = vector.broadcast %cst_28 : f32 to vector<4x256xf32>
    %87 = arith.maximumf %85, %86 : vector<4x256xf32>
    %c0_29 = arith.constant 0 : index
    %c0_30 = arith.constant 0 : index
    %c0_31 = arith.constant 0 : index
    %88 = vector.load %arg9[%c0_29, %c0_30, %c0_31] : memref<1x4x256xf32, #tpu.memory_space<vmem>>, vector<1x4x256xf32>
    %89 = vector.shape_cast %88 : vector<1x4x256xf32> to vector<4x256xf32>
    %90 = vector.shape_cast %87 : vector<4x256xf32> to vector<1x4x256xf32>
    tpu.vector_store %arg9[%c0_29, %c0_30, %c0_31], %90 {strides = array<i32>} : memref<1x4x256xf32, #tpu.memory_space<vmem>>, vector<1x4x256xf32>,
    return
  }
  func.func @transform_0(%arg0: i32) -> (i32, i32, i32) {
    %c0_i32 = arith.constant 0 : i32
    %c0_i32_0 = arith.constant 0 : i32
    %c0_i32_1 = arith.constant 0 : i32
    return %arg0, %c0_i32, %c0_i32_0 : i32, i32, i32
  }
  func.func @transform_1(%arg0: i32) -> (i32, i32, i32) {
    %c0_i32 = arith.constant 0 : i32
    %c0_i32_0 = arith.constant 0 : i32
    %c0_i32_1 = arith.constant 0 : i32
    return %arg0, %c0_i32, %c0_i32_0 : i32, i32, i32
  }
  func.func @transform_2(%arg0: i32) -> (i32, i32) {
    %c0_i32 = arith.constant 0 : i32
    %c0_i32_0 = arith.constant 0 : i32
    %c0_i32_1 = arith.constant 0 : i32
    return %c0_i32, %c0_i32_0 : i32, i32
  }
  func.func @transform_3(%arg0: i32) -> (i32, i32) {
    %c0_i32 = arith.constant 0 : i32
    %c0_i32_0 = arith.constant 0 : i32
    %c0_i32_1 = arith.constant 0 : i32
    return %c0_i32, %c0_i32_0 : i32, i32
  }
  func.func @transform_4(%arg0: i32) -> (i32, i32) {
    %c0_i32 = arith.constant 0 : i32
    %c0_i32_0 = arith.constant 0 : i32
    %c0_i32_1 = arith.constant 0 : i32
    return %c0_i32, %c0_i32_0 : i32, i32
  }
  func.func @transform_5(%arg0: i32) -> (i32, i32) {
    %c0_i32 = arith.constant 0 : i32
    %c0_i32_0 = arith.constant 0 : i32
    %c0_i32_1 = arith.constant 0 : i32
    return %c0_i32, %c0_i32_0 : i32, i32
  }
  func.func @transform_6(%arg0: i32) -> (i32, i32) {
    %c0_i32 = arith.constant 0 : i32
    %c0_i32_0 = arith.constant 0 : i32
    %c0_i32_1 = arith.constant 0 : i32
    return %c0_i32, %c0_i32_0 : i32, i32
  }
  func.func @transform_7(%arg0: i32) -> (i32, i32) {
    %c0_i32 = arith.constant 0 : i32
    %c0_i32_0 = arith.constant 0 : i32
    %c0_i32_1 = arith.constant 0 : i32
    return %c0_i32, %c0_i32_0 : i32, i32
  }
  func.func @transform_8(%arg0: i32) -> (i32, i32, i32) {
    %c0_i32 = arith.constant 0 : i32
    %c0_i32_0 = arith.constant 0 : i32
    %c0_i32_1 = arith.constant 0 : i32
    return %arg0, %c0_i32, %c0_i32_0 : i32, i32, i32
  }
}

</mosaic_0001>

<bundles_post_ra>
// kernel: tpu_custom_call.1
= control target key start
LH: loop header
LB: loop body
LE: loop exit
PB: predicated region body
PF: predicated region fallthrough
CT: control target
= control target key end

     0   :  { %s2007_s0 = inlined_call_operand.hbm [shape: f32[2,4,64], index: 0, kind: input, shape index: {}]   ;;  %s2008_s1 = inlined_call_operand.hbm [shape: f32[2,4,256], index: 1, kind: input, shape index: {}]   ;;  %s2009_s2 = inlined_call_operand.hbm [shape: f32[64,256], index: 2, kind: input, shape index: {}]   ;;  %s2010_s3 = inlined_call_operand.vmem [shape: f32[4,72], index: 3, kind: input, shape index: {}]   ;;  %s2011_s4 = inlined_call_operand.vmem [shape: f32[4,1], index: 4, kind: input, shape index: {}]   ;;  %s2012_s5 = inlined_call_operand.hbm [shape: f32[4,36], index: 5, kind: input, shape index: {}]   ;;  %s2013_s6 = inlined_call_operand.vmem [shape: f32[4,1], index: 6, kind: input, shape index: {}]   ;;  %s2014_s7 = inlined_call_operand.vmem [shape: f32[9,256], index: 7, kind: input, shape index: {}]   ;;  %s2015_s8 = inlined_call_operand.hbm [shape: f32[2,4,256], index: 8, kind: output, shape index: {}]  }
   0x1   :  { %2020 = sst [smem:[#allocation17_spill]] %s2007_s0 }
   0x2   :  { %2021 = sst [smem:[#allocation18_spill]] %s2009_s2 }
   0x3   :  { %2022 = sst [smem:[#allocation19_spill]] %s2012_s5 }
   0x4   :  { %13 = vsyncpa [#allocation3], 0 }
   0x5   :  { %15 = vsyncpa [#allocation3 + $0x1], 0 }
   0x6   :  { %16 = vsyncpa [#allocation6], 0 }
   0x7   :  { %18 = vsyncpa [#allocation6 + $0x1], 0 }
   0x8   :  { %19 = vsyncpa [#allocation9], 0 }
   0x9   :  { %20 = vsyncpa [#allocation4], 0 }
   0xa   :  { %22 = vsyncpa [#allocation4 + $0x1], 0  ;;  %s1449_s27 = smov 0   ;;  %s1451_s28 = smov 0  }
   0xb   :  { %s1453_s29 = smov 0   ;;  %s1455_s30 = smov 0  }
   0xc LB: > { %s1470_s9 = sadd.s32 4294967295, %s1385_s30   ;;  %s1035_s10 = sadd.s32 4294967294, %s1385_s30   ;;  %s1385_s30 = sphi %s1455_s30, %s2048_s30   ;;  %s1381_s29 = sphi %s1453_s29, %s2047_s29   ;;  %s1377_s28 = sphi %s1451_s28, %s2046_s28   ;;  %s1373_s27 = sphi %s1449_s27, %s2045_s27  }
   0xd   : > { %p48_p0 = scmp.ne.s32.totalorder %s1377_s28, %s1373_s27  ;;  %p2016_p1 = scmp.eq.s32.totalorder %s1470_s9, 0 }
   0xe   : > { %p230_p3 = scmp.eq.s32.totalorder %s1035_s10, 1  ;;  %p1036_p5 = scmp.ge.s32.totalorder %s1385_s30, 1 }
   0xf   : > { %p1479_p4 = por %p2016_p1, %p48_p0  ;;  %p237_p7 = scmp.lt.s32.totalorder %s1385_s30, 3 }
  0x10   : > { %p1484_p6 = por %p230_p3, %p48_p0  ;;  %s1387_s14 = smov [#allocation7]  }
  0x11   : > { %s2023_s11 = scalar_select %p1479_p4, 1, 0 }
  0x12   : > { %s2024_s12 = scalar_select %p1484_p6, 1, 0 }
  0x13   : > { %p1489_p8 = pnand %p1036_p5, %p237_p7  ;;  %s249_s15 = sshll.u32 %s1387_s14, 4  ;;  %s1493_s15 = int_to_ptr.vmem [resolvable:$true] %s249_s15 }
  0x14   : > { %s1388_s17 = smov [#allocation8]   ;;  %s2027_s2 = sld [smem:[#allocation18_spill]] }
  0x15   : > { %s2025_s13 = scalar_select %p1489_p8, 1, 0 }
  0x16   : > { %p1119_p9 = pneg %p1489_p8  ;;  %s269_s18 = sshll.u32 %s1388_s17, 4  ;;  %s1504_s18 = int_to_ptr.vmem [resolvable:$true] %s269_s18 }
  0x18   : > { %p1500_p11 = pnand %p1119_p9, %p2016_p1 }
  0x1a   : > { %s1191_s21 = scalar_lea.hbm %s2027_s2, 2048  ;;  %p1193_p13 = pneg %p1500_p11 }
  0x1b   : > { %p1192_p12 = scmp.ne.s32.totalorder %s2027_s2, %s1191_s21  ;;  %p1198_p5 = scmp.lt.u32.totalorder %s1191_s21, %s2027_s2 }
  0x1d   : > { %p1194_p0 = pnand %p1193_p13, %p1192_p12 }
  0x1f   : > { %p1195_p3 = pneg %p1194_p0 }
  0x21   : > { %p1200_p7 = pnand %p1198_p5, %p1195_p3 }
  0x23   : > { %1203 = shalt.err (!%p1200_p7)
}
  0x24   : > { %s1204_s26 = scalar_lea.vmem %s1493_s15, 2048  ;;  %p1212_p2 = scmp.lt.s32.totalorder %s1493_s15, %s1493_s15 }
  0x25   : > { %p1205_p9 = scmp.ne.s32.totalorder %s1493_s15, %s1204_s26  ;;  %p1213_p12 = scmp.lt.s32.totalorder %s1204_s26, %s1204_s26 }
  0x27   : > { %p1207_p10 = pnand %p1205_p9, %p1193_p13  ;;  %p1214_p0 = por %p1213_p12, %p1212_p2 }
  0x29   : > { %p1208_p1 = pneg %p1207_p10 }
  0x2b   : > { %p1215_p6 = pnand %p1214_p0, %p1208_p1 }
  0x2d   : > { %1218 = shalt.err (!%p1215_p6)
}
  0x2e   : > { %s1389_s10 = smov 256   ;;  %s1390_s14 = smov 16  }
  0x2f   : > { %1122 = dma.hbm_to_vmem [thread:$0]  (!%p1500_p11), %s2027_s2, 2048, %s1493_s15, [#allocation6], %s1389_s10, %s1389_s10, %s1390_s14  }
  0x30   : > { %s2028_s5 = sld [smem:[#allocation19_spill]] }
  0x36   : > { %s1219_s22 = scalar_lea.hbm %s2028_s5, 64 }
  0x37   : > { %p1220_p2 = scmp.ne.s32.totalorder %s2028_s5, %s1219_s22  ;;  %p1226_p10 = scmp.lt.u32.totalorder %s1219_s22, %s2028_s5 }
  0x39   : > { %p1222_p1 = pnand %p1220_p2, %p1193_p13 }
  0x3b   : > { %p1223_p6 = pneg %p1222_p1 }
  0x3d   : > { %p1228_p3 = pnand %p1226_p10, %p1223_p6 }
  0x3f   : > { %1231 = shalt.err (!%p1228_p3)
}
  0x40   : > { %s1232_s15 = scalar_lea.vmem %s1504_s18, 64  ;;  %p1240_p12 = scmp.lt.s32.totalorder %s1504_s18, %s1504_s18 }
  0x41   : > { %p1233_p5 = scmp.ne.s32.totalorder %s1504_s18, %s1232_s15  ;;  %p1241_p0 = scmp.lt.s32.totalorder %s1232_s15, %s1232_s15 }
  0x43   : > { %p1235_p7 = pnand %p1233_p5, %p1193_p13  ;;  %p1242_p2 = por %p1241_p0, %p1240_p12 }
  0x45   : > { %p1236_p9 = pneg %p1235_p7 }
  0x47   : > { %p1243_p1 = pnand %p1242_p2, %p1236_p9 }
  0x49   : > { %1246 = shalt.err (!%p1243_p1)
}
  0x4a   : > { %1125 = dma.hbm_to_vmem [thread:$0]  (!%p1500_p11), %s2028_s5, 64, %s1504_s18, [#allocation9]  }
  0x4b   : > { %s1559_s17 = sadd.s32 1, %s1385_s30   ;;  %s35_s16 = sadd.s32 1, %s1381_s29 }
  0x4c   : > { %s32_s19 = ssub.s32 %s1385_s30, %s1559_s17  ;;  %p42_p13 = scmp.ne.s32.totalorder %s1381_s29, %s1377_s28 }
  0x4d   : > { %p33_p6 = scmp.eq.s32.totalorder %s32_s19, 0  ;;  %p43_p10 = scmp.eq.s32.totalorder %s1385_s30, 0 }
  0x4e   : > { %p2029_p3 = scmp.eq.s32.totalorder %s1470_s9, 1  ;;  %p1139_p7 = scmp.lt.s32.totalorder %s1385_s30, 2 }
  0x4f   : > { %s1575_s21 = scalar_select %p33_p6, %s1381_s29, %s35_s16  }
  0x50   : > { %p1569_p5 = por %p2029_p3, %p42_p13  ;;  %p44_p9 = por %p43_p10, %p42_p13 }
  0x51   : > { %2031 = sst [smem:[#allocation16_spill]] %s1575_s21  ;;  %s1578_s22 = sand.u32 1, %s1381_s29  }
  0x52   : > { %s2030_s20 = scalar_select %p1569_p5, 1, 0 }
  0x53   : > { %s1040_s18 = sshll.u32 %s1578_s22, 2  ;;  %s1041_s23 = sshll.u32 %s1385_s30, 6 }
  0x54   : > { %s2032_s0 = sld [smem:[#allocation17_spill]]  ;;  %s290_s15 = scalar_lea.vmem [#allocation2], %s1040_s18 }
  0x55   : > { %s297_s10 = sshll.u32 %s290_s15, 4  ;;  %p1589_p11 = pnand %p1139_p7, %p44_p9  ;;  %s1587_s10 = int_to_ptr.vmem [resolvable:$true] %s297_s10 }
  0x56   : > { %s1042_s19 = sshll.u32 %s1578_s22, 3  ;;  %s287_s2 = scalar_lea.sflag [#allocation3], %s1578_s22 }
  0x57   : > { %p1249_p0 = pneg %p1589_p11 }
  0x5a   : > { %s1585_s26 = scalar_lea.hbm %s2032_s0, %s1041_s23  ;;  %s1252_s25 = scalar_lea.hbm %s2032_s0, 128 }
  0x5b   : > { %s1247_s24 = scalar_lea.hbm %s1585_s26, 64  ;;  %p1253_p13 = scmp.lt.u32.totalorder %s1585_s26, %s2032_s0 }
  0x5c   : > { %p1248_p12 = scmp.ne.s32.totalorder %s1585_s26, %s1247_s24  ;;  %p1254_p6 = scmp.lt.u32.totalorder %s1252_s25, %s1247_s24 }
  0x5d   : > { %p1256_p3 = scmp.lt.u32.totalorder %s1247_s24, %s1585_s26 }
  0x5e   : > { %p1250_p2 = pnand %p1249_p0, %p1248_p12  ;;  %p1255_p10 = por %p1254_p6, %p1253_p13 }
  0x60   : > { %p1251_p1 = pneg %p1250_p2  ;;  %p1257_p7 = por %p1256_p3, %p1255_p10 }
  0x62   : > { %p1258_p9 = pnand %p1257_p7, %p1251_p1 }
  0x64   : > { %1261 = shalt.err (!%p1258_p9)
}
  0x65   : > { %s1262_s16 = scalar_lea.vmem %s1587_s10, 64  ;;  %s1391_s18 = smov [#allocation2]  }
  0x66   : > { %p1263_p12 = scmp.ne.s32.totalorder %s1587_s10, %s1262_s16  ;;  %s1267_s23 = sshll.u32 %s1391_s18, 4  ;;  %s1268_s23 = int_to_ptr.vmem [resolvable:$false] %s1267_s23 }
  0x67   : > { %s1269_s5 = scalar_lea.vmem %s1268_s23, 128  ;;  %p1270_p4 = scmp.lt.s32.totalorder %s1587_s10, %s1268_s23 }
  0x68   : > { %p1265_p2 = pnand %p1263_p12, %p1249_p0  ;;  %p1271_p13 = scmp.lt.s32.totalorder %s1269_s5, %s1262_s16 }
  0x6a   : > { %p1266_p5 = pneg %p1265_p2  ;;  %p1272_p6 = por %p1271_p13, %p1270_p4 }
  0x6c   : > { %p1273_p10 = pnand %p1272_p6, %p1266_p5 }
  0x6e   : > { %1276 = shalt.err (!%p1273_p10)
}
  0x6f   : > { %1129 = dma.hbm_to_vmem [thread:$0]  (!%p1589_p11), %s1585_s26, 64, %s1587_s10, %s287_s2  }
  0x70   : > { %s1063_s24 = sshll.u32 %s1385_s30, 7  ;;  %s308_s16 = scalar_lea.vmem [#allocation5], %s1042_s19 }
  0x71   : > { %s1625_s18 = scalar_lea.hbm %s2008_s1, %s1063_s24  ;;  %s316_s23 = sshll.u32 %s308_s16, 4  ;;  %s317_s23 = int_to_ptr.vmem [resolvable:$true] %s316_s23 }
  0x72   : > { %s2034_s5 = sand.u32 1, %s1385_s30   ;;  %s1277_s21 = scalar_lea.hbm %s1625_s18, 128 }
  0x73   : > { %s305_s0 = scalar_lea.sflag [#allocation6], %s2034_s5  ;;  %p1278_p4 = scmp.ne.s32.totalorder %s1625_s18, %s1277_s21 }
  0x74   : > { %s1282_s10 = scalar_lea.hbm %s2008_s1, 256  ;;  %p1283_p3 = scmp.lt.u32.totalorder %s1625_s18, %s2008_s1 }
  0x75   : > { %p1280_p5 = pnand %p1278_p4, %p1249_p0  ;;  %p1284_p7 = scmp.lt.u32.totalorder %s1282_s10, %s1277_s21 }
  0x76   : > { %p1286_p12 = scmp.lt.u32.totalorder %s1277_s21, %s1625_s18 }
  0x77   : > { %p1281_p1 = pneg %p1280_p5  ;;  %p1285_p9 = por %p1284_p7, %p1283_p3 }
  0x79   : > { %p1287_p2 = por %p1286_p12, %p1285_p9 }
  0x7b   : > { %p1288_p13 = pnand %p1287_p2, %p1281_p1 }
  0x7d   : > { %1291 = shalt.err (!%p1288_p13)
}
  0x7e   : > { %s1292_s19 = scalar_lea.vmem %s317_s23, 128  ;;  %s1392_s25 = smov [#allocation5]  }
  0x7f   : > { %p1293_p6 = scmp.ne.s32.totalorder %s317_s23, %s1292_s19  ;;  %s1297_s15 = sshll.u32 %s1392_s25, 4  ;;  %s1298_s15 = int_to_ptr.vmem [resolvable:$false] %s1297_s15 }
  0x80   : > { %s1299_s16 = scalar_lea.vmem %s1298_s15, 256  ;;  %p1300_p5 = scmp.lt.s32.totalorder %s317_s23, %s1298_s15 }
  0x81   : > { %p1295_p10 = pnand %p1293_p6, %p1249_p0  ;;  %p1301_p8 = scmp.lt.s32.totalorder %s1299_s16, %s1292_s19 }
  0x83   : > { %p1296_p4 = pneg %p1295_p10  ;;  %p1302_p3 = por %p1301_p8, %p1300_p5 }
  0x85   : > { %p1303_p7 = pnand %p1302_p3, %p1296_p4 }
  0x87   : > { %1306 = shalt.err (!%p1303_p7)
}
  0x88   : > { %1132 = dma.hbm_to_vmem [thread:$0]  (!%p1589_p11), %s1625_s18, 128, %s317_s23, %s305_s0  }
  0x89   : > { %p2035_p1 = scmp.ne.s32.totalorder %s2025_s13, 0 }
  0x8a   : > { %s1653_s21 = sand.u32 (!%p2035_p1), 1, %s1377_s28   ;;  %p2036_p8 = scmp.ne.s32.totalorder (!%p2035_p1), %s2023_s11, 0 }
  0x8b   : > { %325 = sbr.rel (%p2035_p1) target bundleno = 1145 (0x479), region = 52  ;;  %s1046_s5 = sshll.u32 (!%p2035_p1), %s1653_s21, 2 }
  0x8c   : > { %s328_s2 = scalar_lea.sflag (!%p2035_p1), [#allocation3], %s1653_s21  ;;  %s1657_s26 = scalar_lea.vmem (!%p2035_p1), [#allocation2], %s1046_s5 }
  0x92   : > { %1352 = dma.done.wait (%p2036_p8), %s328_s2, 64  }
  0x93   : > { %1354 = vsyncadd (%p2036_p8), %s328_s2, 4294967232  ;;  %s336_s0 = sand.u32 1, %s1470_s9   ;;  %s1047_s13 = sshll.u32 %s1653_s21, 3 }
  0x94   : > { %s337_s14 = scalar_lea.sflag [#allocation6], %s336_s0  ;;  %s1667_s18 = scalar_lea.vmem [#allocation5], %s1047_s13 }
  0x95   : > { %1356 = dma.done.wait (%p2036_p8), %s337_s14, 128  }
  0x96   : > { %1358 = vsyncadd (%p2036_p8), %s337_s14, 4294967168  ;;  %p2037_p11 = scmp.eq.s32.totalorder %s1470_s9, 0 }
  0x98   : > { %1360 = dma.done.wait (%p2037_p11), [#allocation6], 2048   ;;  %p2038_p0 = pmov %p2037_p11 }
  0x9a   : > { %1362 = vsyncadd (%p2038_p0), [#allocation6], 4294965248  ;;  %p2039_p9 = pmov %p2038_p0 }
  0x9b   : > { %p2040_p12 = pmov %p2038_p0 }
  0x9c   : > { %1364 = dma.done.wait (%p2039_p9), [#allocation9], 64  }
  0x9d   : > { %1366 = vsyncadd (%p2040_p12), [#allocation9], 4294967232  ;;  %v1393_v0 = vmov 0.0   ;;  %v388_v1 = vld [vmem:[#allocation7 + $0x8] sm:$0xff]  ;;  %v390_v2 = vld [vmem:[#allocation7 + $0x18] sm:$0xff]  ;;  %vm403_vm0 = vcmask 523264   ;;  %v501_v36 = vlaneseq }
  0x9e   : > { %471 = vmatprep.mubr.f32.mxu0 %v1393_v0  ;;  %708 = vmatprep.mubr.f32.mxu1 %v1393_v0  ;;  %v387_v3 = vld [vmem:[#allocation7] sm:$0xff]  ;;  %v1065_v4 = vpack.c.bf16 %v390_v2, %v388_v1  ;;  %v389_v5 = vld [vmem:[#allocation7 + $0x10] sm:$0xff]  ;;  %v392_v6 = vld [vmem:[#allocation7 + $0x28] sm:$0xff]  ;;  %vm488_vm1 = vcmask 1043456   ;;  %s1394_s11 = smov 16   ;;  %s1395_s23 = smov 17  }
  0x9f   : > { %v394_v7 = vld [vmem:[#allocation7 + $0x38] sm:$0xff]  ;;  %v1067_v8 = vpack.c.bf16 %v389_v5, %v387_v3  ;;  %v391_v10 = vld [vmem:[#allocation7 + $0x20] sm:$0xff]  ;;  %v393_v11 = vld [vmem:[#allocation7 + $0x30] sm:$0xff]  ;;  %s1396_s10 = smov 15   ;;  %s1397_s22 = smov 1   ;;  %v1400_v34 = vmov 0  }
  0xa0   : > { %v1069_v9 = vpack.c.bf16 %v394_v7, %v392_v6  ;;  %v396_v12 = vld [vmem:[#allocation7 + $0x48] sm:$0xff]  ;;  %1066 = vmatprep.subr.bf16.mxu0 %v1065_v4  ;;  %v398_v13 = vld [vmem:[#allocation7 + $0x58] sm:$0xff]  ;;  %v1071_v14 = vpack.c.bf16 %v393_v11, %v391_v10  ;;  %v395_v16 = vld [vmem:[#allocation7 + $0x40] sm:$0xff]  ;;  %s1398_s24 = smov 127   ;;  %s1399_s19 = smov 113   ;;  %1189 = vset.pattern.permute.xlu0 %v1400_v34  ;;  %v1724_v39 = vshrl.u32 %v501_v36, 7 }
  0xa1   : > { %1068 = vmatpush1.bf16.msra.mxu0 %v1067_v8  ;;  %v1073_v15 = vpack.c.bf16 %v398_v13, %v396_v12  ;;  %v397_v17 = vld [vmem:[#allocation7 + $0x50] sm:$0xff]  ;;  %v400_v18 = vld [vmem:[#allocation7 + $0x68] sm:$0xff]  ;;  %v402_v19 = vld [vmem:[#allocation7 + $0x78] sm:$0xff]  ;;  %s1401_s25 = smov 112   ;;  %s1402_s15 = smov 111   ;;  %v1726_v40 = vand.u32 127, %v501_v36 }
  0xa2   : > { %1070 = vmatprep.subr.bf16.mxu0 %v1069_v9  ;;  %v1075_v20 = vpack.c.bf16 %v397_v17, %v395_v16  ;;  %v1077_v21 = vpack.c.bf16 %v402_v19, %v400_v18  ;;  %v399_v22 = vld [vmem:[#allocation7 + $0x60] sm:$0xff]  ;;  %v401_v23 = vld [vmem:[#allocation7 + $0x70] sm:$0xff]  ;;  %v386_v25 = vld [vmem:[%s1657_s26] sm:$0xf]  ;;  %v525_v42 = vsub.s32 1, %v1724_v39  ;;  %v559_v46 = vsub.s32 3, %v1724_v39 }
  0xa3   : > { %v1079_v24 = vpack.c.bf16 %v401_v23, %v399_v22  ;;  %v478_v27 = vld [vmem:[%s1667_s18] sm:$0xff]  ;;  %v496_v35 = vld [vmem:[%s2011_s4] sm:$0xf]  ;;  %vm520_vm2 = vcmp.lt.s32.totalorder %v1726_v40, 16  ;;  %v508_v47 = vsub.s32 0, %v1724_v39  ;;  %v542_v48 = vsub.s32 2, %v1724_v39 }
  0xa4   : > { %v480_v30 = vcombine.high %v478_v27, %v478_v27  ;;  %v1732_v44 = vld [vmem:[%s2014_s7] sm:$0xff]  ;;  %v1737_v45 = vld [vmem:[%s2014_s7 + $0x8] sm:$0xff]  ;;  %v576_v52 = vsub.s32 5, %v1724_v39  ;;  %vm537_vm3 = vcmp.lt.s32.totalorder %v1726_v40, 15  ;;  %vm554_vm4 = vcmp.lt.s32.totalorder %v1726_v40, 1  ;;  %s909_s14 = scalar_lea.sflag [#allocation4], %s1653_s21 }
  0xa5   : > { %1072 = vmatpush1.bf16.msra.mxu0 %v1071_v14  ;;  %v1744_v49 = vrot.slane %v1732_v44, %v525_v42  ;;  %v1748_v53 = vrot.slane %v1737_v45, %v525_v42  ;;  %v1757_v56 = vrot.slane %v1737_v45, %v559_v46  ;;  %vm503_vm5 = vcmp.lt.s32.totalorder %v1726_v40, 17  ;;  %p2041_p13 = scmp.ne.s32.totalorder %s2030_s20, 0 }
  0xa6   : > { %1074 = vmatprep.subr.bf16.mxu0 %v1073_v15  ;;  %v1761_v57 = vrot.slane %v1732_v44, %v508_v47  ;;  %v1764_v58 = vrot.slane %v1737_v45, %v508_v47  ;;  %v1767_v59 = vrot.slane %v1737_v45, %v542_v48  ;;  %v1770_v60 = vrot.slane %v1732_v44, %v559_v46 }
  0xa7   : > { %vm571_vm6 = vcmp.lt.s32.totalorder %v1726_v40, 127  ;;  %v1792_v10 = vrot.slane %v1732_v44, %v542_v48  ;;  %v1799_v18 = vrot.slane %v1732_v44, %v576_v52  ;;  %vm588_vm7 = vcmp.lt.s32.totalorder %v1726_v40, 113  ;;  %v1842_v48 = vld [vmem:[%s2014_s7 + $0x18] ss:$0 sm:$0xff] }
  0xa8   : > { %vm605_vm8 = vcmp.lt.s32.totalorder %v1726_v40, 112  ;;  %vm622_vm9 = vcmp.lt.s32.totalorder %v1726_v40, 111  ;;  %vm640_vm10 = vcmask 588800   ;;  %vm820_vm11 = vcmask 293888  }
  0xa9   : > { %1076 = vmatpush1.bf16.msra.mxu0 %v1075_v20  ;;  %v593_v20 = vsub.s32 6, %v1724_v39 }
  0xaa   : > { %1078 = vmatprep.subr.bf16.mxu0 %v1077_v21 }
  0xad   : > { %1080 = vmatpush1.bf16.msra.mxu0 %v1079_v24  ;;  %v610_v24 = vsub.s32 7, %v1724_v39 }
  0xaf   : > { %v1823_v36 = vrot.slane %v1737_v45, %v610_v24 }
  0xb0   : > { %1051 = vmatmul.mubr.msk.f32.vlgmr.msra.gmra.mrb[0].mxu0 %vm403_vm0, %v386_v25 }
  0xb1   : > { %894 = vmatprep.mubr.f32.mxu0 %v1393_v0  ;;  %v1775_v0 = vrot.slane %v1737_v45, %v576_v52 }
 0x183   : > { %v473_v26 = vpop.f32.mrb[0].mxu0 }
 0x184   : > { %v484_v28 = vrot.slane %v473_v26, 4  ;;  %v475_v29 = vpop.f32.mrb[1].mxu0 }
 0x185   : > { %v485_v32 = vrot.slane %v475_v29, 4  ;;  %v1812_v29 = vrot.slane %v1732_v44, %v593_v20 }
 0x186   : > { %v1684_v31 = vsel %vm488_vm1, %v478_v27, %v484_v28 }
 0x187   : > { %516 = vrot.lane.b32.xlu1 %v1684_v31, %s1394_s11  ;;  %497 = vrot.lane.b32.xlu0 %v1684_v31, %s1395_s23  ;;  %v1691_v33 = vsel %vm488_vm1, %v480_v30, %v485_v32  ;;  %v1815_v30 = vrot.slane %v1737_v45, %v593_v20 }
 0x18b   : > { %533 = vrot.lane.b32.xlu0 %v1684_v31, %s1396_s10  ;;  %518 = vrot.lane.b32.xlu1 %v1691_v33, %s1394_s11 }
 0x18f   : > { %550 = vrot.lane.b32.xlu0 %v1684_v31, %s1397_s22  ;;  %535 = vrot.lane.b32.xlu1 %v1691_v33, %s1396_s10 }
 0x193   : > { %552 = vrot.lane.b32.xlu1 %v1691_v33, %s1397_s22  ;;  %499 = vrot.lane.b32.xlu0 %v1691_v33, %s1395_s23 }
 0x197   : > { %569 = vrot.lane.b32.xlu1 %v1691_v33, %s1398_s24  ;;  %567 = vrot.lane.b32.xlu0 %v1684_v31, %s1398_s24 }
 0x19b   : > { %586 = vrot.lane.b32.xlu1 %v1691_v33, %s1399_s19  ;;  %584 = vrot.lane.b32.xlu0 %v1684_v31, %s1399_s19 }
 0x19f   : > { %603 = vrot.lane.b32.xlu1 %v1691_v33, %s1401_s25  ;;  %601 = vrot.lane.b32.xlu0 %v1684_v31, %s1401_s25 }
 0x1a3   : > { %620 = vrot.lane.b32.xlu1 %v1691_v33, %s1402_s15  ;;  %618 = vrot.lane.b32.xlu0 %v1684_v31, %s1402_s15 }
 0x1a7   : > { %637 = vperm.xlu0 %1189, %v496_v35   ;;  %v1820_v35 = vrot.slane %v1732_v44, %v610_v24 }
 0x1f9   : > { %v517_v37 = vpop.permute.xlu1 %516  ;;  %v498_v38 = vpop.permute.xlu0 %497 }
 0x1fd   : > { %v534_v41 = vpop.permute.xlu0 %533  ;;  %v519_v43 = vpop.permute.xlu1 %518 }
 0x1fe   : > { %v521_v54 = vsel %vm520_vm2, %v517_v37, %v519_v43  ;;  %v522_v55 = vsel %vm520_vm2, %v519_v43, %v517_v37 }
 0x1ff   : > { %v531_v61 = vmul.f32 %v1744_v49, %v522_v55  ;;  %v532_v1 = vmul.f32 %v1748_v53, %v521_v54  ;;  %v1849_v55 = vld [vmem:[%s2014_s7 + $0x10] ss:$0 sm:$0xff] }
 0x201   : > { %v551_v50 = vpop.permute.xlu0 %550  ;;  %v536_v51 = vpop.permute.xlu1 %535 }
 0x202   : > { %v538_v2 = vsel %vm537_vm3, %v534_v41, %v536_v51  ;;  %v539_v11 = vsel %vm537_vm3, %v536_v51, %v534_v41 }
 0x203   : > { %v549_v12 = vmul.f32 %v1767_v59, %v538_v2  ;;  %v548_v25 = vmul.f32 %v1792_v10, %v539_v11 }
 0x205   : > { %v553_v62 = vpop.permute.xlu1 %552  ;;  %v500_v63 = vpop.permute.xlu0 %499 }
 0x206   : > { %v555_v3 = vsel %vm554_vm4, %v551_v50, %v553_v62  ;;  %v504_v4 = vsel %vm503_vm5, %v498_v38, %v500_v63  ;;  %v505_v5 = vsel %vm503_vm5, %v500_v63, %v498_v38  ;;  %v556_v6 = vsel %vm554_vm4, %v553_v62, %v551_v50 }
 0x207   : > { %v566_v7 = vmul.f32 %v1757_v56, %v555_v3  ;;  %v514_v8 = vmul.f32 %v1761_v57, %v505_v5  ;;  %v515_v9 = vmul.f32 %v1764_v58, %v504_v4  ;;  %v565_v17 = vmul.f32 %v1770_v60, %v556_v6 }
 0x209   : > { %v570_v13 = vpop.permute.xlu1 %569  ;;  %v568_v14 = vpop.permute.xlu0 %567  ;;  %v1081_v15 = vpack.c.bf16 %v532_v1, %v515_v9  ;;  %v1083_v16 = vpack.c.bf16 %v531_v61, %v514_v8  ;;  %v1085_v23 = vpack.c.bf16 %v566_v7, %v549_v12  ;;  %v1087_v32 = vpack.c.bf16 %v565_v17, %v548_v25  ;;  %v495_v1 = vld [vmem:[%s2010_s3] sm:$0xf] }
 0x20a   : > { %v573_v19 = vsel %vm571_vm6, %v570_v13, %v568_v14  ;;  %v572_v21 = vsel %vm571_vm6, %v568_v14, %v570_v13  ;;  %v718_v9 = vld [vmem:[%s2013_s6] sm:$0xf] }
 0x20b   : > { %v583_v22 = vmul.f32 %v1775_v0, %v573_v19  ;;  %1082 = vmatprep.subr.bf16.mxu1 %v1081_v15  ;;  %v582_v28 = vmul.f32 %v1799_v18, %v572_v21 }
 0x20c   : > { %1084 = vmatpush1.bf16.msra.mxu1 %v1083_v16 }
 0x20d   : > { %v587_v26 = vpop.permute.xlu1 %586  ;;  %1086 = vmatprep.subr.bf16.mxu1 %v1085_v23  ;;  %v585_v27 = vpop.permute.xlu0 %584  ;;  %v1089_v34 = vpack.c.bf16 %v583_v22, %v1691_v33  ;;  %v1091_v43 = vpack.c.bf16 %v582_v28, %v1684_v31 }
 0x20e   : > { %v589_v37 = vsel %vm588_vm7, %v585_v27, %v587_v26  ;;  %v590_v38 = vsel %vm588_vm7, %v587_v26, %v585_v27 }
 0x20f   : > { %v599_v44 = vmul.f32 %v1812_v29, %v589_v37  ;;  %v600_v45 = vmul.f32 %v1815_v30, %v590_v38 }
 0x210   : > { %1088 = vmatpush1.bf16.msra.mxu1 %v1087_v32 }
 0x211   : > { %v604_v39 = vpop.permute.xlu1 %603  ;;  %1090 = vmatprep.subr.bf16.mxu1 %v1089_v34  ;;  %v602_v41 = vpop.permute.xlu0 %601 }
 0x212   : > { %v606_v33 = vsel %vm605_vm8, %v602_v41, %v604_v39  ;;  %v607_v42 = vsel %vm605_vm8, %v604_v39, %v602_v41 }
 0x213   : > { %v616_v46 = vmul.f32 %v1820_v35, %v606_v33  ;;  %v617_v47 = vmul.f32 %v1823_v36, %v607_v42 }
 0x214   : > { %1092 = vmatpush1.bf16.msra.mxu1 %v1091_v43 }
 0x215   : > { %v621_v50 = vpop.permute.xlu1 %620  ;;  %v619_v51 = vpop.permute.xlu0 %618  ;;  %v1093_v52 = vpack.c.bf16 %v617_v47, %v600_v45  ;;  %v1095_v31 = vpack.c.bf16 %v616_v46, %v599_v44 }
 0x216   : > { %v624_v54 = vsel %vm622_vm9, %v621_v50, %v619_v51  ;;  %v623_v61 = vsel %vm622_vm9, %v619_v51, %v621_v50 }
 0x217   : > { %v634_v62 = vmul.f32 %v1842_v48, %v624_v54  ;;  %1094 = vmatprep.subr.bf16.mxu1 %v1093_v52  ;;  %v633_v63 = vmul.f32 %v1849_v55, %v623_v61 }
 0x218   : > { %1096 = vmatpush1.bf16.msra.mxu1 %v1095_v31 }
 0x219   : > { %660 = vmatprep.subr.mxu1 %v634_v62 }
 0x21c   : > { %661 = vmatpush1.msra.mxu1 %v633_v63 }
 0x21d   : > { %1054 = vmatmul.mubr.msk.f32.vlgmr.msra.gmra.mrb[0].mxu1 %vm640_vm10, %v495_v1 }
 0x226   : > { %v638_v2 = vpop.permute.xlu0 %637 }
 0x2f0   : > { %v710_v3 = vpop.f32.mrb[0].mxu1 }
 0x2f1   : > { %v711_v4 = vadd.f32 %v710_v3, %v638_v2  ;;  %v712_v5 = vpop.f32.mrb[1].mxu1 }
 0x2f2   : > { %v713_v7 = vadd.f32 %v712_v5, %v638_v2 }
 0x2f3   : > { %v1858_v6 = vmax.f32 %v711_v4, 0.0 }
 0x2f4   : > { %v1864_v8 = vmax.f32 %v713_v7, 0.0 }
 0x2f5   : > { %743 = vrot.lane.b32.xlu0 %v1858_v6, %s1397_s22  ;;  %727 = vrot.lane.b32.xlu1 %v1858_v6, %s1394_s11 }
 0x2f9   : > { %719 = vrot.lane.b32.xlu0 %v1858_v6, %s1395_s23  ;;  %729 = vrot.lane.b32.xlu1 %v1864_v8, %s1394_s11 }
 0x2fd   : > { %735 = vrot.lane.b32.xlu0 %v1858_v6, %s1396_s10  ;;  %745 = vrot.lane.b32.xlu1 %v1864_v8, %s1397_s22  ;;  %s385_s22 = scalar_lea.vmem [#allocation10], %s1047_s13 }
 0x301   : > { %751 = vrot.lane.b32.xlu0 %v1858_v6, %s1398_s24  ;;  %721 = vrot.lane.b32.xlu1 %v1864_v8, %s1395_s23 }
 0x305   : > { %767 = vrot.lane.b32.xlu0 %v1858_v6, %s1401_s25  ;;  %737 = vrot.lane.b32.xlu1 %v1864_v8, %s1396_s10  ;;  %s1064_s10 = sshll.u32 %s1470_s9, 7  ;;  %s1403_s9 = smov [#allocation10]  }
 0x306   : > { %s1311_s13 = sshll.u32 %s1403_s9, 4  ;;  %s1312_s13 = int_to_ptr.vmem [resolvable:$false] %s1311_s13 }
 0x307   : > { %s1313_s16 = scalar_lea.vmem %s1312_s13, 256 }
 0x309   : > { %759 = vrot.lane.b32.xlu0 %v1858_v6, %s1399_s19  ;;  %753 = vrot.lane.b32.xlu1 %v1864_v8, %s1398_s24  ;;  %s923_s24 = sshll.u32 %s385_s22, 4  ;;  %s1965_s24 = int_to_ptr.vmem [resolvable:$true] %s923_s24 }
 0x30a   : > { %s1307_s18 = scalar_lea.vmem %s1965_s24, 128  ;;  %p1314_p4 = scmp.lt.s32.totalorder %s1965_s24, %s1312_s13 }
 0x30b   : > { %p1308_p2 = scmp.ne.s32.totalorder %s1965_s24, %s1307_s18  ;;  %p1315_p5 = scmp.lt.s32.totalorder %s1313_s16, %s1307_s18 }
 0x30d   : > { %775 = vrot.lane.b32.xlu0 %v1858_v6, %s1402_s15  ;;  %769 = vrot.lane.b32.xlu1 %v1864_v8, %s1401_s25  ;;  %p1309_p6 = pnand %p1308_p2, %p2041_p13  ;;  %p1316_p3 = por %p1315_p5, %p1314_p4 }
 0x30f   : > { %p1310_p10 = pneg %p1309_p6 }
 0x311   : > { %817 = vperm.xlu0 %1189, %v718_v9   ;;  %761 = vrot.lane.b32.xlu1 %v1864_v8, %s1399_s19  ;;  %p1317_p7 = pnand %p1316_p3, %p1310_p10 }
 0x315   : > { %777 = vrot.lane.b32.xlu1 %v1864_v8, %s1402_s15  ;;  %s1963_s15 = scalar_lea.hbm %s2015_s8, %s1064_s10 }
 0x367   : > { %v744_v11 = vpop.permute.xlu0 %743  ;;  %v728_v12 = vpop.permute.xlu1 %727 }
 0x36b   : > { %v720_v13 = vpop.permute.xlu0 %719  ;;  %v730_v14 = vpop.permute.xlu1 %729 }
 0x36c   : > { %v731_v17 = vsel %vm520_vm2, %v728_v12, %v730_v14  ;;  %v732_v19 = vsel %vm520_vm2, %v730_v14, %v728_v12 }
 0x36d   : > { %v733_v23 = vmul.f32 %v732_v19, %v1744_v49  ;;  %v734_v24 = vmul.f32 %v731_v17, %v1748_v53 }
 0x36f   : > { %v736_v15 = vpop.permute.xlu0 %735  ;;  %v746_v16 = vpop.permute.xlu1 %745  ;;  %v785_v39 = vrot.slane %v733_v23, 4  ;;  %v786_v49 = vrot.slane %v734_v24, 4 }
 0x370   : > { %v747_v20 = vsel %vm554_vm4, %v744_v11, %v746_v16  ;;  %v748_v21 = vsel %vm554_vm4, %v746_v16, %v744_v11 }
 0x371   : > { %v749_v27 = vmul.f32 %v748_v21, %v1770_v60  ;;  %v750_v28 = vmul.f32 %v747_v20, %v1757_v56 }
 0x373   : > { %v722_v22 = vpop.permute.xlu1 %721  ;;  %v752_v32 = vpop.permute.xlu0 %751  ;;  %v791_v33 = vrot.slane %v749_v27, 4  ;;  %v792_v42 = vrot.slane %v750_v28, 4 }
 0x374   : > { %v723_v25 = vsel %vm503_vm5, %v720_v13, %v722_v22  ;;  %v724_v26 = vsel %vm503_vm5, %v722_v22, %v720_v13 }
 0x375   : > { %v725_v34 = vmul.f32 %v724_v26, %v1761_v57  ;;  %v726_v37 = vmul.f32 %v723_v25, %v1764_v58 }
 0x377   : > { %v738_v38 = vpop.permute.xlu1 %737  ;;  %v807_v43 = vsel %vm488_vm1, %v725_v34, %v785_v39  ;;  %v768_v57 = vpop.permute.xlu0 %767  ;;  %v808_v45 = vsel %vm488_vm1, %v726_v37, %v786_v49 }
 0x378   : > { %v739_v53 = vsel %vm537_vm3, %v736_v15, %v738_v38  ;;  %v740_v41 = vsel %vm537_vm3, %v738_v38, %v736_v15 }
 0x379   : > { %v741_v60 = vmul.f32 %v740_v41, %v1792_v10  ;;  %v742_v56 = vmul.f32 %v739_v53, %v1767_v59 }
 0x37b   : > { %v809_v58 = vsel %vm488_vm1, %v741_v60, %v791_v33  ;;  %v754_v44 = vpop.permute.xlu1 %753  ;;  %v810_v46 = vsel %vm488_vm1, %v742_v56, %v792_v42  ;;  %v760_v62 = vpop.permute.xlu0 %759 }
 0x37c   : > { %v755_v47 = vsel %vm571_vm6, %v752_v32, %v754_v44  ;;  %v756_v50 = vsel %vm571_vm6, %v754_v44, %v752_v32  ;;  %v1097_v51 = vpack.c.bf16 %v810_v46, %v808_v45  ;;  %v1099_v10 = vpack.c.bf16 %v809_v58, %v807_v43 }
 0x37d   : > { %v757_v59 = vmul.f32 %v755_v47, %v1799_v18  ;;  %v758_v52 = vmul.f32 %v756_v50, %v1775_v0 }
 0x37e   : > { %1098 = vmatprep.subr.bf16.mxu0 %v1097_v51 }
 0x37f   : > { %1100 = vmatpush1.bf16.msra.mxu0 %v1099_v10  ;;  %v770_v31 = vpop.permute.xlu1 %769  ;;  %v797_v2 = vrot.slane %v757_v59, 4  ;;  %v798_v3 = vrot.slane %v758_v52, 4  ;;  %v776_v12 = vpop.permute.xlu0 %775 }
 0x380   : > { %v771_v54 = vsel %vm605_vm8, %v768_v57, %v770_v31  ;;  %v772_v61 = vsel %vm605_vm8, %v770_v31, %v768_v57 }
 0x381   : > { %v773_v63 = vmul.f32 %v771_v54, %v1820_v35  ;;  %v774_v1 = vmul.f32 %v772_v61, %v1823_v36  ;;  %v811_v35 = vsel %vm488_vm1, %v1858_v6, %v797_v2  ;;  %v812_v14 = vsel %vm488_vm1, %v1864_v8, %v798_v3  ;;  %v717_v8 = vld [vmem:[#allocation8] sm:$0xf] }
 0x383   : > { %v762_v4 = vpop.permute.xlu1 %761  ;;  %v803_v5 = vrot.slane %v773_v63, 4  ;;  %v804_v7 = vrot.slane %v774_v1, 4 }
 0x384   : > { %v763_v18 = vsel %vm588_vm7, %v760_v62, %v762_v4  ;;  %v764_v0 = vsel %vm588_vm7, %v762_v4, %v760_v62 }
 0x385   : > { %v765_v9 = vmul.f32 %v763_v18, %v1812_v29  ;;  %v766_v11 = vmul.f32 %v764_v0, %v1815_v30 }
 0x387   : > { %v813_v36 = vsel %vm488_vm1, %v765_v9, %v803_v5  ;;  %v778_v13 = vpop.permute.xlu1 %777  ;;  %v814_v15 = vsel %vm488_vm1, %v766_v11, %v804_v7 }
 0x388   : > { %v780_v16 = vsel %vm622_vm9, %v778_v13, %v776_v12  ;;  %v1101_v17 = vpack.c.bf16 %v814_v15, %v812_v14  ;;  %v1103_v19 = vpack.c.bf16 %v813_v36, %v811_v35  ;;  %v779_v30 = vsel %vm622_vm9, %v776_v12, %v778_v13 }
 0x389   : > { %v782_v29 = vmul.f32 %v1842_v48, %v780_v16  ;;  %v781_v6 = vmul.f32 %v1849_v55, %v779_v30 }
 0x38a   : > { %1102 = vmatprep.subr.bf16.mxu0 %v1101_v17 }
 0x38b   : > { %1104 = vmatpush1.bf16.msra.mxu0 %v1103_v19 }
 0x38c   : > { %1055 = vmatprep.subr.msk.mxu0 %vm488_vm1, %v782_v29 }
 0x38f   : > { %1056 = vmatpush1.msk.msra.mxu0 %vm488_vm1, %v781_v6 }
 0x390   : > { %1057 = vmatmul.mubr.msk.f32.vlgmr.msra.gmra.mrb[2].mxu0 %vm820_vm11, %v717_v8  ;;  %v818_v20 = vpop.permute.xlu0 %817 }
 0x463   : > { %v896_v21 = vpop.f32.mrb[2].mxu0 }
 0x464   : > { %v897_v48 = vadd.f32 %v896_v21, %v818_v20  ;;  %v898_v40 = vpop.f32.mrb[3].mxu0 }
 0x465   : > { %v899_v22 = vadd.f32 %v898_v40, %v818_v20 }
 0x466   : > { %v901_v23 = vmax.f32 %v897_v48, 0.0 }
 0x467   : > { %v902_v24 = vmax.f32 %v899_v22, 0.0 }
 0x469   : > { %v905_v25 = vcombine.low %v901_v23, %v902_v24 }
 0x46b   : > { %907 = vst [vmem:[%s385_s22] sm:$0xff] %v905_v25 }
 0x46c   : > { %1320 = shalt.err (!%p1317_p7)
}
 0x46d   : > { %s1321_s21 = scalar_lea.hbm %s1963_s15, 128  ;;  %s1325_s26 = scalar_lea.hbm %s2015_s8, 256 }
 0x46e   : > { %p1322_p1 = scmp.ne.s32.totalorder %s1963_s15, %s1321_s21  ;;  %p1326_p0 = scmp.lt.u32.totalorder %s1963_s15, %s2015_s8 }
 0x46f   : > { %p1327_p9 = scmp.lt.u32.totalorder %s1325_s26, %s1321_s21  ;;  %p1329_p2 = scmp.lt.u32.totalorder %s1321_s21, %s1963_s15 }
 0x470   : > { %p1323_p8 = pnand %p1322_p1, %p2041_p13 }
 0x471   : > { %p1328_p12 = por %p1327_p9, %p1326_p0 }
 0x472   : > { %p1324_p11 = pneg %p1323_p8 }
 0x473   : > { %p1330_p6 = por %p1329_p2, %p1328_p12 }
 0x475   : > { %p1331_p10 = pnand %p1330_p6, %p1324_p11 }
 0x477   : > { %1334 = shalt.err (!%p1331_p10)
}
 0x478   : > { %1117 = dma.vmem_to_hbm [thread:$0]  (%p2041_p13), %s1965_s24, 128, %s1963_s15, %s909_s14  }
 0x479 PF: > { %s935_s23 = sand.u32 1, %s1373_s27   ;;  %p2042_p4 = scmp.ne.s32.totalorder %s2024_s12, 0 }
 0x47a   : > { %p2043_p5 = scmp.ge.s32.totalorder %s1385_s30, 2  ;;  %s936_s10 = scalar_lea.sflag [#allocation4], %s935_s23 }
 0x47c   : > { %p1134_p3 = pnand %p2043_p5, %p2042_p4 }
 0x47e   : > { %1368 = dma.done.wait (!%p1134_p3), %s936_s10, 128  }
 0x47f   : > { %1370 = vsyncadd (!%p1134_p3), %s936_s10, 4294967168  ;;  %s2044_s22 = sld [smem:[#allocation16_spill]]  ;;  %p25_p7 = scmp.ge.s32.totalorder %s1559_s17, 4  }
 0x480   : > { %s2045_s27 = smov %s1377_s28  ;;  %s2046_s28 = smov %s1381_s29 }
 0x481   : > { %s2048_s30 = smov %s1559_s17  ;;  %27 = sbr.rel (!%p25_p7) target bundleno = 12 (0xc), region = 118 }
 0x485   : > { %s2047_s29 = smov %s2044_s22 }
 0x488   :  { %941 = vsyncpa [#allocation3], 1 }
 0x489   :  { %943 = vsyncpa [#allocation3 + $0x1], 1 }
 0x48a   :  { %944 = vsyncpa [#allocation6], 1 }
 0x48b   :  { %946 = vsyncpa [#allocation6 + $0x1], 1 }
 0x48c   :  { %947 = vsyncpa [#allocation9], 1 }
 0x48d   :  { %948 = vsyncpa [#allocation4], 1 }
 0x48e   :  { %950 = vsyncpa [#allocation4 + $0x1], 1 }

</bundles_post_ra>
